<compile_context>
chip_gen: v7x
topology: tpu7x:2x2x1
jax: 0.10.0
libtpu: 0.0.40
codegen_flags: <defaults>
</compile_context>

<pallas_src>
import jax
import jax.numpy as jnp
from jax.experimental import pallas as pl
from jax.experimental.pallas import tpu as pltpu

INPUT_LEN = 13
H1 = 256
H2 = 64
OUT = 13
TILE_B_DEFAULT = 4096   # batch columns per grid step (lane axis, multiple of 128)


def _cdiv(n, m):
    return -(-n // m)


def _round_up(n, m):
    return _cdiv(n, m) * m


def _generator_kernel(xt_ref, w1_ref, b1_ref, w2_ref, b2_ref, w3_ref, b3_ref,
                      ot_ref):
    """Feature-major MLP: activations are (features, tile_b)."""
    xt = xt_ref[...]                                               # (13, TILE_B)

    # Layer 1: (256,13) @ (13,TILE_B) + (256,1) -> LeakyReLU(0.2)
    h1 = jnp.dot(w1_ref[...], xt, preferred_element_type=jnp.float32) + b1_ref[...]
    h1 = jnp.maximum(h1, 0.2 * h1)                                 # mul + max (VPU)

    # Layer 2: (64,256) @ (256,TILE_B) + (64,1) -> LeakyReLU(0.2)
    h2 = jnp.dot(w2_ref[...], h1, preferred_element_type=jnp.float32) + b2_ref[...]
    h2 = jnp.maximum(h2, 0.2 * h2)

    # Layer 3: (13,64) @ (64,TILE_B) + (13,1) -> Sigmoid (EUP exp + approx recip)
    h3 = jnp.dot(w3_ref[...], h2, preferred_element_type=jnp.float32) + b3_ref[...]
    e = jnp.exp(-h3)
    ot_ref[...] = pl.reciprocal(1.0 + e, approx=True).astype(ot_ref.dtype)


def generator_forward(x, params, tile_b_max=TILE_B_DEFAULT):
    """x: (B, 13) float32.  params: torch-layout weights/biases.  Returns (B, 13)."""
    B = x.shape[0]
    w1, b1, w2, b2, w3, b3 = (
        params["w1"], params["b1"], params["w2"],
        params["b2"], params["w3"], params["b3"],
    )

    # Adaptive tiling: choose the number of grid steps first, then the smallest
    # 128-multiple tile covering B in that many steps.  Keeps per-step work
    # large while padding B by < 128 rows per step.
    n_steps = max(1, _cdiv(B, tile_b_max))
    tile_b = _round_up(_cdiv(B, n_steps), 128)
    b_pad = n_steps * tile_b

    # Feature-major activation layout: batch is the lane axis.
    xt = x.T                                                       # (13, B)
    if b_pad != B:
        xt = jnp.pad(xt, ((0, 0), (0, b_pad - B)))                 # zero cols, sliced off below

    xt_spec = pl.BlockSpec((INPUT_LEN, tile_b), lambda i: (0, i))
    ot_spec = pl.BlockSpec((OUT, tile_b), lambda i: (0, i))

    def resident(arr):
        # Whole array as one block, same block every grid step -> fetched once
        # and kept VMEM-resident (weights + biases total ~113 KB).
        return pl.BlockSpec(arr.shape, lambda i: (0, 0))

    weight_bytes = 4 * (w1.size + b1.size + w2.size + b2.size + w3.size + b3.size)
    cost = pl.CostEstimate(
        flops=2 * b_pad * (INPUT_LEN * H1 + H1 * H2 + H2 * OUT),
        transcendentals=b_pad * OUT,
        bytes_accessed=4 * b_pad * (INPUT_LEN + OUT) + weight_bytes,
    )

    out_t = pl.pallas_call(
        _generator_kernel,
        out_shape=jax.ShapeDtypeStruct((OUT, b_pad), jnp.float32),
        grid=(n_steps,),
        in_specs=[xt_spec, resident(w1), resident(b1),
                  resident(w2), resident(b2), resident(w3), resident(b3)],
        out_specs=ot_spec,
        compiler_params=pltpu.CompilerParams(
            # TODO(synk): on v7x, switch this axis to pltpu.CORE_PARALLEL (or a
            # pl.core_map over create_tensorcore_mesh) to genuinely shard grid
            # steps across the two TensorCores; "parallel" is kept here because
            # it compiles and runs safely on every generation.
            dimension_semantics=("parallel",),
            vmem_limit_bytes=32 * 1024 * 1024,
        ),
        cost_estimate=cost,
    )(xt, w1, b1, w2, b2, w3, b3)

    return out_t[:, :B].T                                          # (B, 13)


def init_params(key):
    """Deterministic synthetic parameters in PyTorch nn.Linear layout.

    w: (out_features, in_features), b: (out_features, 1), both drawn from
    uniform(-1/sqrt(fan_in), 1/sqrt(fan_in)) like torch's default init.
    """
    ks = jax.random.split(key, 6)

    def lin(kw, kb, fan_in, fan_out):
        bound = float(fan_in) ** -0.5
        w = jax.random.uniform(kw, (fan_out, fan_in), jnp.float32, -bound, bound)
        b = jax.random.uniform(kb, (fan_out, 1), jnp.float32, -bound, bound)
        return w, b

    w1, b1 = lin(ks[0], ks[1], INPUT_LEN, H1)
    w2, b2 = lin(ks[2], ks[3], H1, H2)
    w3, b3 = lin(ks[4], ks[5], H2, OUT)
    return {"w1": w1, "b1": b1, "w2": w2, "b2": b2, "w3": w3, "b3": b3}


def _reference(x, p):
    h1 = x @ p["w1"].T + p["b1"].T
    h1 = jnp.where(h1 > 0, h1, 0.2 * h1)
    h2 = h1 @ p["w2"].T + p["b2"].T
    h2 = jnp.where(h2 > 0, h2, 0.2 * h2)
    h3 = h2 @ p["w3"].T + p["b3"].T
    return jax.nn.sigmoid(h3)


if __name__ == "__main__":
    key = jax.random.PRNGKey(0)
    k_param, k1, k2, k3 = jax.random.split(key, 4)
    params = init_params(k_param)

    # Tiny batch: single grid step, tile shrinks to 128 columns.
    x_small = jax.random.normal(k1, (8, INPUT_LEN), jnp.float32)
    y_small = jax.block_until_ready(generator_forward(x_small, params))
    assert y_small.shape == (8, OUT), y_small.shape
    # atol covers the EUP approx-reciprocal in the sigmoid (outputs in [0,1]).
    assert jnp.allclose(y_small, _reference(x_small, params), atol=5e-3), \
        "small-batch mismatch vs reference"

    # Multi-step grid (tile_b_max=128 -> 3 pipelined steps, 300 -> 384 columns).
    x_med = jax.random.normal(k2, (300, INPUT_LEN), jnp.float32)
    y_med = jax.block_until_ready(generator_forward(x_med, params, tile_b_max=128))
    assert y_med.shape == (300, OUT), y_med.shape
    assert jnp.allclose(y_med, _reference(x_med, params), atol=5e-3), \
        "multi-step mismatch vs reference"

    # Default tiling with a non-multiple batch: 600 -> one 640-wide step
    # (previous version padded 600 -> 1024 rows).
    x_big = jax.random.normal(k3, (600, INPUT_LEN), jnp.float32)
    y_big = jax.block_until_ready(generator_forward(x_big, params))
    assert y_big.shape == (600, OUT), y_big.shape
    assert jnp.allclose(y_big, _reference(x_big, params), atol=5e-3), \
        "large-batch mismatch vs reference"

    print("KERNEL_OK")
</pallas_src>

<mosaic_0001>
module attributes {stable_mosaic.version = 11 : i64} {
  func.func @_generator_kernel(%arg0: i32, %arg1: memref<13x128xf32, #tpu.memory_space<vmem>>, %arg2: memref<256x13xf32, #tpu.memory_space<vmem>>, %arg3: memref<256x1xf32, #tpu.memory_space<vmem>>, %arg4: memref<64x256xf32, #tpu.memory_space<vmem>>, %arg5: memref<64x1xf32, #tpu.memory_space<vmem>>, %arg6: memref<13x64xf32, #tpu.memory_space<vmem>>, %arg7: memref<13x1xf32, #tpu.memory_space<vmem>>, %arg8: memref<13x128xf32, #tpu.memory_space<vmem>>) attributes {dimension_semantics = [#tpu.dimension_semantics<parallel>], iteration_bounds = array<i64: 1>, scalar_prefetch = 0 : i64, scratch_operands = 0 : i64, tpu.core_type = #tpu.core_type<tc>, window_params = [{transform_indices = @transform_0, window_bounds = array<i64: 13, 128>}, {pipeline_mode = #tpu.pipeline_mode<synchronous>, transform_indices = @transform_1, window_bounds = array<i64: 256, 13>}, {pipeline_mode = #tpu.pipeline_mode<synchronous>, transform_indices = @transform_2, window_bounds = array<i64: 256, 1>}, {pipeline_mode = #tpu.pipeline_mode<synchronous>, transform_indices = @transform_3, window_bounds = array<i64: 64, 256>}, {pipeline_mode = #tpu.pipeline_mode<synchronous>, transform_indices = @transform_4, window_bounds = array<i64: 64, 1>}, {pipeline_mode = #tpu.pipeline_mode<synchronous>, transform_indices = @transform_5, window_bounds = array<i64: 13, 64>}, {pipeline_mode = #tpu.pipeline_mode<synchronous>, transform_indices = @transform_6, window_bounds = array<i64: 13, 1>}, {transform_indices = @transform_7, window_bounds = array<i64: 13, 128>}]} {
    %c0 = arith.constant 0 : index
    %c0_0 = arith.constant 0 : index
    %0 = vector.load %arg1[%c0, %c0_0] : memref<13x128xf32, #tpu.memory_space<vmem>>, vector<13x128xf32>
    %c0_1 = arith.constant 0 : index
    %c0_2 = arith.constant 0 : index
    %1 = vector.load %arg2[%c0_1, %c0_2] : memref<256x13xf32, #tpu.memory_space<vmem>>, vector<256x13xf32>
    %cst = arith.constant dense<0.000000e+00> : vector<256x128xf32>
    %2 = tpu.matmul %1, %0, %cst {dimension_numbers = #tpu.dot_dimension_numbers<[1], [0], [0], [1], [0, 0, 1, 1], [], []>} : vector<256x13xf32>, vector<13x128xf32>, vector<256x128xf32> -> vector<256x128xf32>
    %c0_3 = arith.constant 0 : index
    %c0_4 = arith.constant 0 : index
    %3 = vector.load %arg3[%c0_3, %c0_4] : memref<256x1xf32, #tpu.memory_space<vmem>>, vector<256x1xf32>
    %4 = vector.broadcast %3 : vector<256x1xf32> to vector<256x128xf32>
    %5 = arith.addf %2, %4 : vector<256x128xf32>
    %cst_5 = arith.constant 2.000000e-01 : f32
    %6 = vector.broadcast %cst_5 : f32 to vector<256x128xf32>
    %7 = arith.mulf %6, %5 : vector<256x128xf32>
    %8 = arith.maximumf %5, %7 : vector<256x128xf32>
    %c0_6 = arith.constant 0 : index
    %c0_7 = arith.constant 0 : index
    %9 = vector.load %arg4[%c0_6, %c0_7] : memref<64x256xf32, #tpu.memory_space<vmem>>, vector<64x256xf32>
    %cst_8 = arith.constant dense<0.000000e+00> : vector<64x128xf32>
    %10 = tpu.matmul %9, %8, %cst_8 {dimension_numbers = #tpu.dot_dimension_numbers<[1], [0], [0], [1], [0, 0, 1, 1], [], []>} : vector<64x256xf32>, vector<256x128xf32>, vector<64x128xf32> -> vector<64x128xf32>
    %c0_9 = arith.constant 0 : index
    %c0_10 = arith.constant 0 : index
    %11 = vector.load %arg5[%c0_9, %c0_10] : memref<64x1xf32, #tpu.memory_space<vmem>>, vector<64x1xf32>
    %12 = vector.broadcast %11 : vector<64x1xf32> to vector<64x128xf32>
    %13 = arith.addf %10, %12 : vector<64x128xf32>
    %cst_11 = arith.constant 2.000000e-01 : f32
    %14 = vector.broadcast %cst_11 : f32 to vector<64x128xf32>
    %15 = arith.mulf %14, %13 : vector<64x128xf32>
    %16 = arith.maximumf %13, %15 : vector<64x128xf32>
    %c0_12 = arith.constant 0 : index
    %c0_13 = arith.constant 0 : index
    %17 = vector.load %arg6[%c0_12, %c0_13] : memref<13x64xf32, #tpu.memory_space<vmem>>, vector<13x64xf32>
    %cst_14 = arith.constant dense<0.000000e+00> : vector<13x128xf32>
    %18 = tpu.matmul %17, %16, %cst_14 {dimension_numbers = #tpu.dot_dimension_numbers<[1], [0], [0], [1], [0, 0, 1, 1], [], []>} : vector<13x64xf32>, vector<64x128xf32>, vector<13x128xf32> -> vector<13x128xf32>
    %c0_15 = arith.constant 0 : index
    %c0_16 = arith.constant 0 : index
    %19 = vector.load %arg7[%c0_15, %c0_16] : memref<13x1xf32, #tpu.memory_space<vmem>>, vector<13x1xf32>
    %20 = vector.broadcast %19 : vector<13x1xf32> to vector<13x128xf32>
    %21 = arith.addf %18, %20 : vector<13x128xf32>
    %cst_17 = arith.constant 0.000000e+00 : f32
    %22 = vector.broadcast %cst_17 : f32 to vector<13x128xf32>
    %23 = arith.subf %22, %21 : vector<13x128xf32>
    %24 = math.exp %23 : vector<13x128xf32>
    %cst_18 = arith.constant 1.000000e+00 : f32
    %25 = vector.broadcast %cst_18 : f32 to vector<13x128xf32>
    %26 = arith.addf %25, %24 : vector<13x128xf32>
    %27 = tpu.reciprocal %26 {approx = true} : vector<13x128xf32> -> vector<13x128xf32>
    %c0_19 = arith.constant 0 : index
    %c0_20 = arith.constant 0 : index
    %28 = vector.load %arg8[%c0_19, %c0_20] : memref<13x128xf32, #tpu.memory_space<vmem>>, vector<13x128xf32>
    tpu.vector_store %arg8[%c0_19, %c0_20], %27 {strides = array<i32>} : memref<13x128xf32, #tpu.memory_space<vmem>>, vector<13x128xf32>,
    return
  }
  func.func @transform_0(%arg0: i32) -> (i32, i32) {
    %c0_i32 = arith.constant 0 : i32
    %c0_i32_0 = arith.constant 0 : i32
    return %c0_i32, %arg0 : i32, i32
  }
  func.func @transform_1(%arg0: i32) -> (i32, i32) {
    %c0_i32 = arith.constant 0 : i32
    %c0_i32_0 = arith.constant 0 : i32
    %c0_i32_1 = arith.constant 0 : i32
    return %c0_i32, %c0_i32_0 : i32, i32
  }
  func.func @transform_2(%arg0: i32) -> (i32, i32) {
    %c0_i32 = arith.constant 0 : i32
    %c0_i32_0 = arith.constant 0 : i32
    %c0_i32_1 = arith.constant 0 : i32
    return %c0_i32, %c0_i32_0 : i32, i32
  }
  func.func @transform_3(%arg0: i32) -> (i32, i32) {
    %c0_i32 = arith.constant 0 : i32
    %c0_i32_0 = arith.constant 0 : i32
    %c0_i32_1 = arith.constant 0 : i32
    return %c0_i32, %c0_i32_0 : i32, i32
  }
  func.func @transform_4(%arg0: i32) -> (i32, i32) {
    %c0_i32 = arith.constant 0 : i32
    %c0_i32_0 = arith.constant 0 : i32
    %c0_i32_1 = arith.constant 0 : i32
    return %c0_i32, %c0_i32_0 : i32, i32
  }
  func.func @transform_5(%arg0: i32) -> (i32, i32) {
    %c0_i32 = arith.constant 0 : i32
    %c0_i32_0 = arith.constant 0 : i32
    %c0_i32_1 = arith.constant 0 : i32
    return %c0_i32, %c0_i32_0 : i32, i32
  }
  func.func @transform_6(%arg0: i32) -> (i32, i32) {
    %c0_i32 = arith.constant 0 : i32
    %c0_i32_0 = arith.constant 0 : i32
    %c0_i32_1 = arith.constant 0 : i32
    return %c0_i32, %c0_i32_0 : i32, i32
  }
  func.func @transform_7(%arg0: i32) -> (i32, i32) {
    %c0_i32 = arith.constant 0 : i32
    %c0_i32_0 = arith.constant 0 : i32
    return %c0_i32, %arg0 : i32, i32
  }
}

</mosaic_0001>

<bundles_post_ra>
// kernel: tpu_custom_call.1
= control target key start
LH: loop header
LB: loop body
LE: loop exit
PB: predicated region body
PF: predicated region fallthrough
CT: control target
= control target key end

     0   :  { %vm350_vm0 = vcmask 1044480   ;;  %vm1251_vm1 = vmmov 1   ;;  %vm253_vm3 = vcmask 105472   ;;  %v1252_v4 = vmov 0   ;;  %s1696_s0 = inlined_call_operand.vmem [shape: f32[13,128], index: 0, kind: input, shape index: {}]   ;;  %s1697_s1 = inlined_call_operand.vmem [shape: f32[256,13], index: 1, kind: input, shape index: {}]   ;;  %s1698_s2 = inlined_call_operand.vmem [shape: f32[256,1], index: 2, kind: input, shape index: {}]   ;;  %s1699_s3 = inlined_call_operand.vmem [shape: f32[64,256], index: 3, kind: input, shape index: {}]   ;;  %s1700_s4 = inlined_call_operand.vmem [shape: f32[64,1], index: 4, kind: input, shape index: {}]   ;;  %s1701_s5 = inlined_call_operand.vmem [shape: f32[13,64], index: 5, kind: input, shape index: {}]   ;;  %s1702_s6 = inlined_call_operand.vmem [shape: f32[13,1], index: 6, kind: input, shape index: {}]   ;;  %s1703_s7 = inlined_call_operand.hbm [shape: f32[13,128], index: 7, kind: output, shape index: {}]  }
   0x1   :  { %v27_v0 = vld [vmem:[%s1696_s0] sm:$0xff]  ;;  %v28_v1 = vld [vmem:[%s1696_s0 + $0x8] sm:$0x1f]  ;;  %vm1159_vm2 = vmpackc.low %vm350_vm0, %vm1251_vm1  ;;  %1218 = vset.pattern.permute.xlu1 %v1252_v4  ;;  %1217 = vset.pattern.permute.xlu0 %v1252_v4 }
   0x2   :  { %v29_v2 = vld [vmem:[%s1697_s1] sm:$0xff]  ;;  %v1158_v3 = vpack.c.bf16 %v28_v1, %v27_v0  ;;  %v30_v7 = vld [vmem:[%s1697_s1 + $0x8] sm:$0xff]  ;;  %v31_v8 = vld [vmem:[%s1697_s1 + $0x10] sm:$0xff] }
   0x3   :  { %1091 = vmatprep.mubr.msk.f32.mxu0 %vm253_vm3, %v29_v2  ;;  %v77_v5 = vld [vmem:[%s1698_s2 + $0x80] sm:$0xff]  ;;  %v78_v9 = vld [vmem:[%s1698_s2 + $0x88] sm:$0xff]  ;;  %v32_v11 = vld [vmem:[%s1697_s1 + $0x18] sm:$0xff] }
   0x4   :  { %v61_v6 = vld [vmem:[%s1698_s2] sm:$0xff]  ;;  %1160 = vmatprep.subr.msk.bf16.mxu0 %vm1159_vm2, %v1158_v3  ;;  %175 = vperm.xlu0 %1217, %v77_v5   ;;  %v62_v10 = vld [vmem:[%s1698_s2 + $0x8] sm:$0xff]  ;;  %v79_v13 = vld [vmem:[%s1698_s2 + $0x90] sm:$0xff] }
   0x5   :  { %1163 = vmatpush3.bf16.msk.msra.mxu0 %vm1159_vm2, %v1158_v3  ;;  %95 = vperm.xlu1 %1218, %v61_v6   ;;  %v33_v12 = vld [vmem:[%s1697_s1 + $0x20] sm:$0xff]  ;;  %v80_v14 = vld [vmem:[%s1698_s2 + $0x98] sm:$0xff]  ;;  %v34_v15 = vld [vmem:[%s1697_s1 + $0x28] sm:$0xff] }
   0x6   :  { %v35_v16 = vld [vmem:[%s1697_s1 + $0x30] sm:$0xff]  ;;  %v64_v18 = vld [vmem:[%s1698_s2 + $0x18] sm:$0xff]  ;;  %v37_v20 = vld [vmem:[%s1697_s1 + $0x40] sm:$0xff] }
   0x7   :  { %v63_v17 = vld [vmem:[%s1698_s2 + $0x10] sm:$0xff]  ;;  %v36_v19 = vld [vmem:[%s1697_s1 + $0x38] sm:$0xff]  ;;  %v81_v21 = vld [vmem:[%s1698_s2 + $0xa0] sm:$0xff] }
   0x8   :  { %1092 = vmatmul.mubr.msk.f32.vlgmr.msra.gmra.mrb[0].mxu0 %vm253_vm3, %v30_v7  ;;  %180 = vperm.xlu0 %1217, %v78_v9   ;;  %v82_v22 = vld [vmem:[%s1698_s2 + $0xa8] sm:$0xff]  ;;  %v39_v24 = vld [vmem:[%s1697_s1 + $0x50] sm:$0xff]  ;;  %v65_v25 = vld [vmem:[%s1698_s2 + $0x20] sm:$0xff] }
   0x9   :  { %1094 = vmatprep.mubr.msk.f32.mxu0 %vm253_vm3, %v31_v8  ;;  %100 = vperm.xlu1 %1218, %v62_v10   ;;  %v38_v23 = vld [vmem:[%s1697_s1 + $0x48] sm:$0xff]  ;;  %v40_v27 = vld [vmem:[%s1697_s1 + $0x58] sm:$0xff]  ;;  %v41_v28 = vld [vmem:[%s1697_s1 + $0x60] sm:$0xff] }
   0xa   :  { %v66_v26 = vld [vmem:[%s1698_s2 + $0x28] sm:$0xff]  ;;  %v83_v29 = vld [vmem:[%s1698_s2 + $0xb0] sm:$0xff] }
   0xc   :  { %1095 = vmatmul.mubr.msk.f32.gmra.mrb[2].mxu0 %vm253_vm3, %v32_v11  ;;  %185 = vperm.xlu0 %1217, %v79_v13  }
   0xd   :  { %1097 = vmatprep.mubr.msk.f32.mxu0 %vm253_vm3, %v33_v12  ;;  %190 = vperm.xlu1 %1218, %v80_v14  }
  0x10   :  { %1098 = vmatmul.mubr.msk.f32.gmra.mrb[4].mxu0 %vm253_vm3, %v34_v15  ;;  %105 = vperm.xlu0 %1217, %v63_v17  }
  0x11   :  { %1100 = vmatprep.mubr.msk.f32.mxu0 %vm253_vm3, %v35_v16  ;;  %110 = vperm.xlu1 %1218, %v64_v18  }
  0x14   :  { %1101 = vmatmul.mubr.msk.f32.gmra.mrb[6].mxu0 %vm253_vm3, %v36_v19  ;;  %195 = vperm.xlu0 %1217, %v81_v21  }
  0x15   :  { %1103 = vmatprep.mubr.msk.f32.mxu0 %vm253_vm3, %v37_v20  ;;  %200 = vperm.xlu1 %1218, %v82_v22  }
  0x18   :  { %1104 = vmatmul.mubr.msk.f32.gmra.mrb[8].mxu0 %vm253_vm3, %v38_v23  ;;  %115 = vperm.xlu0 %1217, %v65_v25  }
  0x19   :  { %1106 = vmatprep.mubr.msk.f32.mxu0 %vm253_vm3, %v39_v24  ;;  %120 = vperm.xlu1 %1218, %v66_v26  }
  0x1a   :  { %12 = vsyncpa [#allocation3], 0  ;;  %v84_v30 = vld [vmem:[%s1698_s2 + $0xb8] sm:$0xff]  ;;  %v42_v31 = vld [vmem:[%s1697_s1 + $0x68] sm:$0xff]  ;;  %vm842_vm4 = vcmask 523264  }
  0x1b   :  { %v43_v32 = vld [vmem:[%s1697_s1 + $0x70] sm:$0xff]  ;;  %v68_v34 = vld [vmem:[%s1698_s2 + $0x38] sm:$0xff]  ;;  %v45_v36 = vld [vmem:[%s1697_s1 + $0x80] sm:$0xff] }
  0x1c   :  { %1107 = vmatmul.mubr.msk.f32.gmra.mrb[10].mxu0 %vm253_vm3, %v40_v27  ;;  %205 = vperm.xlu0 %1217, %v83_v29   ;;  %v67_v33 = vld [vmem:[%s1698_s2 + $0x30] sm:$0xff]  ;;  %v44_v35 = vld [vmem:[%s1697_s1 + $0x78] sm:$0xff]  ;;  %v85_v37 = vld [vmem:[%s1698_s2 + $0xc0] sm:$0xff] }
  0x1d   :  { %1109 = vmatprep.mubr.msk.f32.mxu0 %vm253_vm3, %v41_v28  ;;  %210 = vperm.xlu1 %1218, %v84_v30   ;;  %v86_v38 = vld [vmem:[%s1698_s2 + $0xc8] sm:$0xff]  ;;  %v47_v40 = vld [vmem:[%s1697_s1 + $0x90] sm:$0xff]  ;;  %v69_v41 = vld [vmem:[%s1698_s2 + $0x40] sm:$0xff] }
  0x1e   :  { %v46_v39 = vld [vmem:[%s1697_s1 + $0x88] sm:$0xff]  ;;  %v48_v43 = vld [vmem:[%s1697_s1 + $0x98] sm:$0xff]  ;;  %v49_v44 = vld [vmem:[%s1697_s1 + $0xa0] sm:$0xff] }
  0x1f   :  { %v70_v42 = vld [vmem:[%s1698_s2 + $0x48] sm:$0xff]  ;;  %v87_v45 = vld [vmem:[%s1698_s2 + $0xd0] sm:$0xff]  ;;  %v88_v46 = vld [vmem:[%s1698_s2 + $0xd8] sm:$0xff] }
  0x20   :  { %1110 = vmatmul.mubr.msk.f32.gmra.mrb[12].mxu0 %vm253_vm3, %v42_v31  ;;  %125 = vperm.xlu0 %1217, %v67_v33   ;;  %v50_v47 = vld [vmem:[%s1697_s1 + $0xa8] sm:$0xff]  ;;  %v51_v48 = vld [vmem:[%s1697_s1 + $0xb0] sm:$0xff]  ;;  %v72_v50 = vld [vmem:[%s1698_s2 + $0x58] sm:$0xff] }
  0x21   :  { %1112 = vmatprep.mubr.msk.f32.mxu0 %vm253_vm3, %v43_v32  ;;  %130 = vperm.xlu1 %1218, %v68_v34   ;;  %v71_v49 = vld [vmem:[%s1698_s2 + $0x50] sm:$0xff]  ;;  %v52_v51 = vld [vmem:[%s1697_s1 + $0xb8] sm:$0xff]  ;;  %v53_v52 = vld [vmem:[%s1697_s1 + $0xc0] sm:$0xff] }
  0x22   :  { %v89_v53 = vld [vmem:[%s1698_s2 + $0xe0] sm:$0xff]  ;;  %v90_v54 = vld [vmem:[%s1698_s2 + $0xe8] sm:$0xff]  ;;  %v55_v56 = vld [vmem:[%s1697_s1 + $0xd0] sm:$0xff] }
  0x23   :  { %v54_v55 = vld [vmem:[%s1697_s1 + $0xc8] sm:$0xff]  ;;  %v73_v57 = vld [vmem:[%s1698_s2 + $0x60] sm:$0xff]  ;;  %v56_v59 = vld [vmem:[%s1697_s1 + $0xd8] sm:$0xff] }
  0x24   :  { %1113 = vmatmul.mubr.msk.f32.gmra.mrb[14].mxu0 %vm253_vm3, %v44_v35  ;;  %215 = vperm.xlu0 %1217, %v85_v37   ;;  %v74_v58 = vld [vmem:[%s1698_s2 + $0x68] sm:$0xff]  ;;  %v57_v60 = vld [vmem:[%s1697_s1 + $0xe0] sm:$0xff]  ;;  %v91_v61 = vld [vmem:[%s1698_s2 + $0xf0] sm:$0xff] }
  0x25   :  { %1115 = vmatprep.mubr.msk.f32.mxu0 %vm253_vm3, %v45_v36  ;;  %220 = vperm.xlu1 %1218, %v86_v38   ;;  %v92_v62 = vld [vmem:[%s1698_s2 + $0xf8] sm:$0xff]  ;;  %v58_v63 = vld [vmem:[%s1697_s1 + $0xe8] sm:$0xff]  ;;  %v59_v0 = vld [vmem:[%s1697_s1 + $0xf0] sm:$0xff] }
  0x26   :  { %v75_v1 = vld [vmem:[%s1698_s2 + $0x70] sm:$0xff]  ;;  %v76_v2 = vld [vmem:[%s1698_s2 + $0x78] sm:$0xff]  ;;  %v659_v4 = vld [vmem:[%s1700_s4] sm:$0xff] }
  0x27   :  { %v60_v3 = vld [vmem:[%s1697_s1 + $0xf8] sm:$0xff]  ;;  %v660_v5 = vld [vmem:[%s1700_s4 + $0x8] sm:$0xff]  ;;  %v661_v6 = vld [vmem:[%s1700_s4 + $0x10] sm:$0xff] }
  0x28   :  { %1116 = vmatmul.mubr.msk.f32.gmra.mrb[16].mxu0 %vm253_vm3, %v46_v39  ;;  %135 = vperm.xlu0 %1217, %v69_v41   ;;  %v662_v7 = vld [vmem:[%s1700_s4 + $0x18] sm:$0xff]  ;;  %v663_v8 = vld [vmem:[%s1700_s4 + $0x20] sm:$0xff]  ;;  %v664_v9 = vld [vmem:[%s1700_s4 + $0x28] sm:$0xff] }
  0x29   :  { %1118 = vmatprep.mubr.msk.f32.mxu0 %vm253_vm3, %v47_v40  ;;  %140 = vperm.xlu1 %1218, %v70_v42   ;;  %v665_v10 = vld [vmem:[%s1700_s4 + $0x30] sm:$0xff]  ;;  %v666_v11 = vld [vmem:[%s1700_s4 + $0x38] sm:$0xff]  ;;  %v830_v12 = vld [vmem:[%s1702_s6] sm:$0xff] }
  0x2a   :  { %v831_v13 = vld [vmem:[%s1702_s6 + $0x8] sm:$0x1f] }
  0x2b   :  { %v644_v16 = vld [vmem:[%s1699_s3 + $0x8] sm:$0xff] }
  0x2c   :  { %1119 = vmatmul.mubr.msk.f32.gmra.mrb[18].mxu0 %vm253_vm3, %v48_v43  ;;  %225 = vperm.xlu0 %1217, %v87_v45  }
  0x2d   :  { %1121 = vmatprep.mubr.msk.f32.mxu0 %vm253_vm3, %v49_v44  ;;  %230 = vperm.xlu1 %1218, %v88_v46  }
  0x2e   :  { %771 = vmatprep.mubr.f32.mxu1 %v644_v16 }
  0x30   :  { %1122 = vmatmul.mubr.msk.f32.gmra.mrb[20].mxu0 %vm253_vm3, %v50_v47  ;;  %145 = vperm.xlu0 %1217, %v71_v49  }
  0x31   :  { %1124 = vmatprep.mubr.msk.f32.mxu0 %vm253_vm3, %v51_v48  ;;  %150 = vperm.xlu1 %1218, %v72_v50  }
  0x34   :  { %1125 = vmatmul.mubr.msk.f32.gmra.mrb[22].mxu0 %vm253_vm3, %v52_v51  ;;  %235 = vperm.xlu0 %1217, %v89_v53  }
  0x35   :  { %1127 = vmatprep.mubr.msk.f32.mxu0 %vm253_vm3, %v53_v52  ;;  %240 = vperm.xlu1 %1218, %v90_v54  }
  0x38   :  { %1128 = vmatmul.mubr.msk.f32.gmra.mrb[24].mxu0 %vm253_vm3, %v54_v55  ;;  %155 = vperm.xlu0 %1217, %v73_v57  }
  0x39   :  { %1130 = vmatprep.mubr.msk.f32.mxu0 %vm253_vm3, %v55_v56  ;;  %160 = vperm.xlu1 %1218, %v74_v58  }
  0x3c   :  { %1131 = vmatmul.mubr.msk.f32.gmra.mrb[26].mxu0 %vm253_vm3, %v56_v59  ;;  %245 = vperm.xlu0 %1217, %v91_v61  }
  0x3d   :  { %1133 = vmatprep.mubr.msk.f32.mxu0 %vm253_vm3, %v57_v60  ;;  %250 = vperm.xlu1 %1218, %v92_v62  }
  0x40   :  { %1134 = vmatmul.mubr.msk.f32.gmra.mrb[28].mxu0 %vm253_vm3, %v58_v63  ;;  %165 = vperm.xlu0 %1217, %v75_v1  }
  0x41   :  { %1136 = vmatprep.mubr.msk.f32.mxu0 %vm253_vm3, %v59_v0  ;;  %170 = vperm.xlu1 %1218, %v76_v2  }
  0x44   :  { %1137 = vmatmul.mubr.msk.f32.gmra.mrb[30].mxu0 %vm253_vm3, %v60_v3  ;;  %669 = vperm.xlu0 %1217, %v659_v4  }
  0x45   :  { %674 = vperm.xlu1 %1218, %v660_v5  }
  0x48   :  { %679 = vperm.xlu0 %1217, %v661_v6  }
  0x49   :  { %684 = vperm.xlu1 %1218, %v662_v7  }
  0x4c   :  { %689 = vperm.xlu0 %1217, %v663_v8  }
  0x4d   :  { %694 = vperm.xlu1 %1218, %v664_v9  }
  0x50   :  { %699 = vperm.xlu0 %1217, %v665_v10  }
  0x51   :  { %704 = vperm.xlu1 %1218, %v666_v11  }
  0x54   :  { %834 = vperm.xlu0 %1217, %v830_v12  }
  0x55   :  { %839 = vperm.xlu1 %1218, %v831_v13  }
  0x83   :  { %v1556_v15 = vpop.permute.xlu0 %175 }
  0x84   :  { %v96_v14 = vpop.permute.xlu1 %95 }
  0x87   :  { %v1561_v18 = vpop.permute.xlu0 %180 }
  0x88   :  { %v101_v17 = vpop.permute.xlu1 %100 }
  0x8b   :  { %v1565_v20 = vpop.permute.xlu0 %185 }
  0x8c   :  { %v1563_v19 = vpop.permute.xlu1 %190 }
  0x8f   :  { %v106_v22 = vpop.permute.xlu0 %105 }
  0x90   :  { %v111_v21 = vpop.permute.xlu1 %110 }
  0x93   :  { %v1569_v24 = vpop.permute.xlu0 %195 }
  0x94   :  { %v1567_v23 = vpop.permute.xlu1 %200 }
  0x97   :  { %v116_v26 = vpop.permute.xlu0 %115 }
  0x98   :  { %v121_v25 = vpop.permute.xlu1 %120 }
  0x9b   :  { %v1573_v28 = vpop.permute.xlu0 %205 }
  0x9c   :  { %v1571_v27 = vpop.permute.xlu1 %210 }
  0x9f   :  { %v126_v30 = vpop.permute.xlu0 %125 }
  0xa0   :  { %v131_v29 = vpop.permute.xlu1 %130 }
  0xa3   :  { %v1577_v32 = vpop.permute.xlu0 %215 }
  0xa4   :  { %v1575_v31 = vpop.permute.xlu1 %220 }
  0xa7   :  { %v136_v34 = vpop.permute.xlu0 %135 }
  0xa8   :  { %v141_v33 = vpop.permute.xlu1 %140 }
  0xab   :  { %v1581_v36 = vpop.permute.xlu0 %225 }
  0xac   :  { %v1579_v35 = vpop.permute.xlu1 %230 }
  0xaf   :  { %v146_v45 = vpop.permute.xlu0 %145 }
  0xb0   :  { %v151_v42 = vpop.permute.xlu1 %150 }
  0xb3   :  { %v1587_v61 = vpop.permute.xlu0 %235 }
  0xb4   :  { %v1585_v58 = vpop.permute.xlu1 %240 }
  0xb7   :  { %v156_v12 = vpop.permute.xlu0 %155 }
  0xb8   :  { %v161_v8 = vpop.permute.xlu1 %160 }
  0xdb   :  { %v1093_v37 = vpop.f32.mrb[0].mxu0 }
  0xdc   :  { %v426_v38 = vadd.f32 %v1093_v37, %v101_v17  ;;  %v420_v39 = vpop.f32.mrb[1].mxu0 }
  0xdd   :  { %v421_v40 = vadd.f32 %v420_v39, %v96_v14  ;;  %v1595_v39 = vpop.permute.xlu1 %250 }
  0xde   :  { %v580_v41 = vmul.f32 0.2, %v426_v38 }
  0xdf   :  { %v579_v43 = vmul.f32 0.2, %v421_v40  ;;  %v1096_v44 = vpop.f32.mrb[2].mxu0 }
  0xe0   :  { %v612_v46 = vmax.f32 %v426_v38, %v580_v41  ;;  %v436_v47 = vadd.f32 %v1096_v44, %v111_v21  ;;  %v430_v48 = vpop.f32.mrb[3].mxu0 }
  0xe1   :  { %v611_v49 = vmax.f32 %v421_v40, %v579_v43  ;;  %v431_v50 = vadd.f32 %v430_v48, %v106_v22  ;;  %v1597_v43 = vpop.permute.xlu0 %245 }
  0xe2   :  { %v582_v51 = vmul.f32 0.2, %v436_v47 }
  0xe3   :  { %v581_v52 = vmul.f32 0.2, %v431_v50  ;;  %v1099_v53 = vpop.f32.mrb[4].mxu0  ;;  %v1583_v54 = vpack.c.bf16 %v612_v46, %v611_v49 }
  0xe4   :  { %v614_v55 = vmax.f32 %v436_v47, %v582_v51  ;;  %v446_v56 = vadd.f32 %v1099_v53, %v121_v25  ;;  %v440_v57 = vpop.f32.mrb[5].mxu0  ;;  %v171_v53 = vpop.permute.xlu1 %170 }
  0xe5   :  { %v613_v59 = vmax.f32 %v431_v50, %v581_v52  ;;  %v441_v60 = vadd.f32 %v440_v57, %v116_v26  ;;  %v166_v57 = vpop.permute.xlu0 %165 }
  0xe6   :  { %v584_v62 = vmul.f32 0.2, %v446_v56 }
  0xe7   :  { %v583_v63 = vmul.f32 0.2, %v441_v60  ;;  %v1102_v0 = vpop.f32.mrb[6].mxu0  ;;  %v1589_v1 = vpack.c.bf16 %v614_v55, %v613_v59 }
  0xe8   :  { %v616_v2 = vmax.f32 %v446_v56, %v584_v62  ;;  %v456_v3 = vadd.f32 %v1102_v0, %v131_v29  ;;  %v450_v4 = vpop.f32.mrb[7].mxu0 }
  0xe9   :  { %v615_v5 = vmax.f32 %v441_v60, %v583_v63  ;;  %v451_v6 = vadd.f32 %v450_v4, %v126_v30 }
  0xea   :  { %v586_v7 = vmul.f32 0.2, %v456_v3 }
  0xeb   :  { %v585_v9 = vmul.f32 0.2, %v451_v6  ;;  %v1105_v10 = vpop.f32.mrb[8].mxu0  ;;  %v1591_v11 = vpack.c.bf16 %v616_v2, %v615_v5 }
  0xec   :  { %v618_v13 = vmax.f32 %v456_v3, %v586_v7  ;;  %v466_v14 = vadd.f32 %v1105_v10, %v141_v33  ;;  %v460_v16 = vpop.f32.mrb[9].mxu0 }
  0xed   :  { %v617_v17 = vmax.f32 %v451_v6, %v585_v9  ;;  %v461_v21 = vadd.f32 %v460_v16, %v136_v34 }
  0xee   :  { %v588_v22 = vmul.f32 0.2, %v466_v14 }
  0xef   :  { %v587_v25 = vmul.f32 0.2, %v461_v21  ;;  %v1108_v26 = vpop.f32.mrb[10].mxu0  ;;  %v1593_v37 = vpack.c.bf16 %v618_v13, %v617_v17 }
  0xf0   :  { %v620_v29 = vmax.f32 %v466_v14, %v588_v22  ;;  %v476_v38 = vadd.f32 %v1108_v26, %v151_v42  ;;  %v470_v30 = vpop.f32.mrb[11].mxu0 }
  0xf1   :  { %v619_v40 = vmax.f32 %v461_v21, %v587_v25  ;;  %v471_v41 = vadd.f32 %v470_v30, %v146_v45 }
  0xf2   :  { %v590_v44 = vmul.f32 0.2, %v476_v38 }
  0xf3   :  { %v589_v46 = vmul.f32 0.2, %v471_v41  ;;  %v1111_v33 = vpop.f32.mrb[12].mxu0  ;;  %v1599_v47 = vpack.c.bf16 %v620_v29, %v619_v40 }
  0xf4   :  { %v622_v34 = vmax.f32 %v476_v38, %v590_v44  ;;  %v486_v48 = vadd.f32 %v1111_v33, %v161_v8  ;;  %v480_v49 = vpop.f32.mrb[13].mxu0 }
  0xf5   :  { %v621_v50 = vmax.f32 %v471_v41, %v589_v46  ;;  %v481_v51 = vadd.f32 %v480_v49, %v156_v12 }
  0xf6   :  { %v592_v52 = vmul.f32 0.2, %v486_v48 }
  0xf7   :  { %v591_v42 = vmul.f32 0.2, %v481_v51  ;;  %v1114_v55 = vpop.f32.mrb[14].mxu0  ;;  %v1601_v56 = vpack.c.bf16 %v622_v34, %v621_v50 }
  0xf8   :  { %v624_v45 = vmax.f32 %v486_v48, %v592_v52  ;;  %v496_v59 = vadd.f32 %v1114_v55, %v171_v53  ;;  %v490_v60 = vpop.f32.mrb[15].mxu0 }
  0xf9   :  { %v623_v62 = vmax.f32 %v481_v51, %v591_v42  ;;  %v491_v63 = vadd.f32 %v490_v60, %v166_v57 }
  0xfa   :  { %v594_v0 = vmul.f32 0.2, %v496_v59 }
  0xfb   :  { %v593_v2 = vmul.f32 0.2, %v491_v63  ;;  %v1117_v3 = vpop.f32.mrb[16].mxu0  ;;  %v1603_v4 = vpack.c.bf16 %v624_v45, %v623_v62 }
  0xfc   :  { %v626_v5 = vmax.f32 %v496_v59, %v594_v0  ;;  %v506_v6 = vadd.f32 %v1117_v3, %v1561_v18  ;;  %v500_v7 = vpop.f32.mrb[17].mxu0 }
  0xfd   :  { %v625_v8 = vmax.f32 %v491_v63, %v593_v2  ;;  %v501_v9 = vadd.f32 %v500_v7, %v1556_v15 }
  0xfe   :  { %v596_v10 = vmul.f32 0.2, %v506_v6 }
  0xff   :  { %v595_v12 = vmul.f32 0.2, %v501_v9  ;;  %v1120_v13 = vpop.f32.mrb[18].mxu0  ;;  %v1607_v14 = vpack.c.bf16 %v626_v5, %v625_v8 }
 0x100   :  { %v516_v16 = vadd.f32 %v1120_v13, %v1563_v19  ;;  %v510_v17 = vpop.f32.mrb[19].mxu0  ;;  %v628_v21 = vmax.f32 %v506_v6, %v596_v10 }
 0x101   :  { %v511_v22 = vadd.f32 %v510_v17, %v1565_v20  ;;  %v627_v25 = vmax.f32 %v501_v9, %v595_v12 }
 0x102   :  { %v598_v26 = vmul.f32 0.2, %v516_v16 }
 0x103   :  { %v597_v29 = vmul.f32 0.2, %v511_v22  ;;  %v1123_v38 = vpop.f32.mrb[20].mxu0  ;;  %v1164_v18 = vpack.c.bf16 %v628_v21, %v627_v25 }
 0x104   :  { %v630_v30 = vmax.f32 %v516_v16, %v598_v26  ;;  %v526_v40 = vadd.f32 %v1123_v38, %v1567_v23  ;;  %v520_v15 = vpop.f32.mrb[21].mxu0  ;;  %v649_v38 = vld [vmem:[%s1699_s3 + $0x30] sm:$0xff] }
 0x105   :  { %v629_v41 = vmax.f32 %v511_v22, %v597_v29  ;;  %v521_v44 = vadd.f32 %v520_v15, %v1569_v24  ;;  %1165 = vmatprep.subr.bf16.mxu1 %v1164_v18  ;;  %v650_v29 = vld [vmem:[%s1699_s3 + $0x38] sm:$0xff]  ;;  %v652_v18 = vld [vmem:[%s1699_s3 + $0x48] sm:$0xff]  ;;  %v653_v15 = vld [vmem:[%s1699_s3 + $0x50] sm:$0xff] }
 0x106   :  { %v600_v46 = vmul.f32 0.2, %v526_v40  ;;  %1167 = vmatpush3.bf16.msra.mxu1 %v1583_v54 }
 0x107   :  { %v599_v19 = vmul.f32 0.2, %v521_v44  ;;  %v1126_v33 = vpop.f32.mrb[22].mxu0  ;;  %v1168_v34 = vpack.c.bf16 %v630_v30, %v629_v41  ;;  %v651_v30 = vld [vmem:[%s1699_s3 + $0x40] sm:$0xff]  ;;  %v656_v41 = vld [vmem:[%s1699_s3 + $0x68] sm:$0xff] }
 0x108   :  { %v632_v20 = vmax.f32 %v526_v40, %v600_v46  ;;  %v536_v48 = vadd.f32 %v1126_v33, %v1571_v27  ;;  %v530_v49 = vpop.f32.mrb[23].mxu0  ;;  %v654_v40 = vld [vmem:[%s1699_s3 + $0x58] sm:$0xff]  ;;  %v828_v33 = vld [vmem:[%s1701_s5] sm:$0xff] }
 0x109   :  { %v631_v50 = vmax.f32 %v521_v44, %v599_v19  ;;  %v531_v51 = vadd.f32 %v530_v49, %v1573_v28  ;;  %1169 = vmatprep.subr.bf16.mxu1 %v1168_v34  ;;  %v655_v44 = vld [vmem:[%s1699_s3 + $0x60] sm:$0xff]  ;;  %v658_v46 = vld [vmem:[%s1699_s3 + $0x78] sm:$0xff]  ;;  %v657_v19 = vld [vmem:[%s1699_s3 + $0x70] sm:$0xff]  ;;  %v670_v49 = vpop.permute.xlu0 %669 }
 0x10a   :  { %v602_v23 = vmul.f32 0.2, %v536_v48  ;;  %1171 = vmatpush3.bf16.msra.mxu1 %v1589_v1 }
 0x10b   :  { %v601_v52 = vmul.f32 0.2, %v531_v51  ;;  %v1129_v24 = vpop.f32.mrb[24].mxu0  ;;  %v1172_v53 = vpack.c.bf16 %v632_v20, %v631_v50 }
 0x10c   :  { %v634_v42 = vmax.f32 %v536_v48, %v602_v23  ;;  %v546_v54 = vadd.f32 %v1129_v24, %v1575_v31  ;;  %v540_v55 = vpop.f32.mrb[25].mxu0  ;;  %v675_v24 = vpop.permute.xlu1 %674 }
 0x10d   :  { %v633_v57 = vmax.f32 %v531_v51, %v601_v52  ;;  %v541_v45 = vadd.f32 %v540_v55, %v1577_v32  ;;  %1173 = vmatprep.subr.bf16.mxu1 %v1172_v53 }
 0x10e   :  { %v604_v27 = vmul.f32 0.2, %v546_v54  ;;  %1175 = vmatpush3.bf16.msra.mxu1 %v1591_v11 }
 0x10f   :  { %v603_v59 = vmul.f32 0.2, %v541_v45  ;;  %v1132_v28 = vpop.f32.mrb[26].mxu0  ;;  %v1176_v60 = vpack.c.bf16 %v634_v42, %v633_v57 }
 0x110   :  { %v636_v62 = vmax.f32 %v546_v54, %v604_v27  ;;  %v556_v1 = vadd.f32 %v1132_v28, %v1579_v35  ;;  %v550_v63 = vpop.f32.mrb[27].mxu0  ;;  %v680_v27 = vpop.permute.xlu0 %679 }
 0x111   :  { %v635_v0 = vmax.f32 %v541_v45, %v603_v59  ;;  %v551_v2 = vadd.f32 %v550_v63, %v1581_v36  ;;  %1177 = vmatprep.subr.bf16.mxu1 %v1176_v60 }
 0x112   :  { %v606_v31 = vmul.f32 0.2, %v556_v1  ;;  %1179 = vmatpush3.bf16.msra.mxu1 %v1593_v37 }
 0x113   :  { %v605_v3 = vmul.f32 0.2, %v551_v2  ;;  %v1135_v32 = vpop.f32.mrb[28].mxu0  ;;  %v1180_v5 = vpack.c.bf16 %v636_v62, %v635_v0 }
 0x114   :  { %v638_v6 = vmax.f32 %v556_v1, %v606_v31  ;;  %v566_v11 = vadd.f32 %v1135_v32, %v1585_v58  ;;  %v560_v7 = vpop.f32.mrb[29].mxu0 }
 0x115   :  { %v637_v8 = vmax.f32 %v551_v2, %v605_v3  ;;  %v561_v9 = vadd.f32 %v560_v7, %v1587_v61  ;;  %1181 = vmatprep.subr.bf16.mxu1 %v1180_v5  ;;  %v685_v2 = vpop.permute.xlu1 %684  ;;  %v690_v7 = vpop.permute.xlu0 %689 }
 0x116   :  { %v608_v35 = vmul.f32 0.2, %v566_v11  ;;  %1183 = vmatpush3.bf16.msra.mxu1 %v1599_v47 }
 0x117   :  { %v607_v10 = vmul.f32 0.2, %v561_v9  ;;  %v1138_v36 = vpop.f32.mrb[30].mxu0  ;;  %v1184_v12 = vpack.c.bf16 %v638_v6, %v637_v8 }
 0x118   :  { %v640_v13 = vmax.f32 %v566_v11, %v608_v35  ;;  %v576_v37 = vadd.f32 %v1138_v36, %v1595_v39  ;;  %v570_v16 = vpop.f32.mrb[31].mxu0  ;;  %v643_v39 = vld [vmem:[%s1699_s3] sm:$0xff] }
 0x119   :  { %v639_v17 = vmax.f32 %v561_v9, %v607_v10  ;;  %v571_v21 = vadd.f32 %v570_v16, %v1597_v43  ;;  %1185 = vmatprep.subr.bf16.mxu1 %v1184_v12  ;;  %v646_v43 = vld [vmem:[%s1699_s3 + $0x18] sm:$0xff] }
 0x11a   :  { %v610_v58 = vmul.f32 0.2, %v576_v37  ;;  %1187 = vmatpush3.bf16.msra.mxu1 %v1601_v56  ;;  %v645_v56 = vld [vmem:[%s1699_s3 + $0x10] sm:$0xff] }
 0x11b   :  { %v609_v22 = vmul.f32 0.2, %v571_v21  ;;  %v1188_v61 = vpack.c.bf16 %v640_v13, %v639_v17 }
 0x11c   :  { %v642_v25 = vmax.f32 %v576_v37, %v610_v58  ;;  %v695_v37 = vpop.permute.xlu1 %694 }
 0x11d   :  { %v641_v26 = vmax.f32 %v571_v21, %v609_v22  ;;  %1189 = vmatprep.subr.bf16.mxu1 %v1188_v61 }
 0x11e   :  { %1191 = vmatpush3.bf16.msra.mxu1 %v1603_v4  ;;  %v648_v4 = vld [vmem:[%s1699_s3 + $0x28] sm:$0xff] }
 0x11f   :  { %v1192_v47 = vpack.c.bf16 %v642_v25, %v641_v26  ;;  %v700_v25 = vpop.permute.xlu0 %699 }
 0x121   :  { %1193 = vmatprep.subr.bf16.mxu1 %v1192_v47 }
 0x122   :  { %1195 = vmatpush3.bf16.msra.mxu1 %v1607_v14  ;;  %v647_v14 = vld [vmem:[%s1699_s3 + $0x20] sm:$0xff] }
 0x125   :  { %772 = vmatmul.mubr.f32.vlgmr.msra.gmra.mrb[0].mxu1 %v643_v39 }
 0x126   :  { %776 = vmatprep.mubr.f32.mxu1 %v646_v43 }
 0x129   :  { %777 = vmatmul.mubr.f32.gmra.mrb[2].mxu1 %v645_v56 }
 0x12a   :  { %781 = vmatprep.mubr.f32.mxu1 %v648_v4 }
 0x12d   :  { %782 = vmatmul.mubr.f32.gmra.mrb[4].mxu1 %v647_v14 }
 0x12e   :  { %786 = vmatprep.mubr.f32.mxu1 %v650_v29  ;;  %v705_v29 = vpop.permute.xlu1 %704 }
 0x131   :  { %787 = vmatmul.mubr.f32.gmra.mrb[6].mxu1 %v649_v38 }
 0x132   :  { %791 = vmatprep.mubr.f32.mxu1 %v652_v18 }
 0x135   :  { %792 = vmatmul.mubr.f32.gmra.mrb[8].mxu1 %v651_v30 }
 0x136   :  { %796 = vmatprep.mubr.f32.mxu1 %v654_v40 }
 0x139   :  { %797 = vmatmul.mubr.f32.gmra.mrb[10].mxu1 %v653_v15 }
 0x13a   :  { %801 = vmatprep.mubr.f32.mxu1 %v656_v41 }
 0x13d   :  { %802 = vmatmul.mubr.f32.gmra.mrb[12].mxu1 %v655_v44  ;;  %v829_v44 = vld [vmem:[%s1701_s5 + $0x8] sm:$0x1f]  ;;  %s1253_s5 = smov [#allocation2]  }
 0x13e   :  { %806 = vmatprep.mubr.f32.mxu1 %v658_v46  ;;  %v840_v46 = vpop.permute.xlu1 %839  ;;  %s941_s11 = sshll.u32 %s1253_s5, 4  ;;  %s942_s11 = int_to_ptr.vmem [resolvable:$true] %s941_s11 }
 0x13f   :  { %s1227_s12 = scalar_lea.vmem %s942_s11, 256  ;;  %p1232_p1 = scmp.lt.s32.totalorder %s942_s11, %s942_s11 }
 0x140   :  { %p1228_p0 = scmp.ne.s32.totalorder %s942_s11, %s1227_s12  ;;  %p1233_p2 = scmp.lt.s32.totalorder %s1227_s12, %s1227_s12 }
 0x141   :  { %807 = vmatmul.mubr.f32.gmra.mrb[14].mxu1 %v657_v19 }
 0x142   :  { %1155 = vmatprep.mubr.msk.f32.mxu1 %vm842_vm4, %v828_v33  ;;  %v835_v33 = vpop.permute.xlu0 %834  ;;  %p1234_p3 = por %p1233_p2, %p1232_p1 }
 0x144   :  { %p1235_p4 = pnand %p1234_p3, %p1228_p0 }
 0x1f8   :  { %v1053_v34 = vpop.f32.mrb[0].mxu1 }
 0x1f9   :  { %v1054_v20 = vpop.f32.mrb[1].mxu1 }
 0x1fa   :  { %v1055_v48 = vadd.f32 %v1054_v20, %v1053_v34 }
 0x1fc   :  { %v774_v50 = vadd.f32 %v1055_v48, %v670_v49  ;;  %v1056_v51 = vpop.f32.mrb[2].mxu1 }
 0x1fd   :  { %v1057_v23 = vpop.f32.mrb[3].mxu1 }
 0x1fe   :  { %v1058_v52 = vadd.f32 %v1057_v23, %v1056_v51  ;;  %v812_v53 = vmul.f32 0.2, %v774_v50 }
 0x200   :  { %v779_v42 = vadd.f32 %v1058_v52, %v675_v24  ;;  %v1059_v54 = vpop.f32.mrb[4].mxu1  ;;  %v820_v59 = vmax.f32 %v774_v50, %v812_v53 }
 0x201   :  { %v1060_v55 = vpop.f32.mrb[5].mxu1 }
 0x202   :  { %v813_v57 = vmul.f32 0.2, %v779_v42  ;;  %v1061_v45 = vadd.f32 %v1060_v55, %v1059_v54 }
 0x204   :  { %v821_v28 = vmax.f32 %v779_v42, %v813_v57  ;;  %v784_v60 = vadd.f32 %v1061_v45, %v680_v27  ;;  %v1062_v62 = vpop.f32.mrb[6].mxu1 }
 0x205   :  { %v1063_v1 = vpop.f32.mrb[7].mxu1 }
 0x206   :  { %v1064_v63 = vadd.f32 %v1063_v1, %v1062_v62  ;;  %v1196_v0 = vpack.c.bf16 %v821_v28, %v820_v59  ;;  %v814_v31 = vmul.f32 0.2, %v784_v60 }
 0x208   :  { %v789_v3 = vadd.f32 %v1064_v63, %v685_v2  ;;  %v1065_v32 = vpop.f32.mrb[8].mxu1  ;;  %1197 = vmatprep.subr.bf16.mxu1 %v1196_v0  ;;  %v822_v8 = vmax.f32 %v784_v60, %v814_v31 }
 0x209   :  { %v1066_v5 = vpop.f32.mrb[9].mxu1  ;;  %1199 = vmatpush3.bf16.msra.mxu1 %v1196_v0 }
 0x20a   :  { %v815_v6 = vmul.f32 0.2, %v789_v3  ;;  %v1067_v11 = vadd.f32 %v1066_v5, %v1065_v32 }
 0x20c   :  { %v823_v9 = vmax.f32 %v789_v3, %v815_v6  ;;  %v794_v35 = vadd.f32 %v1067_v11, %v690_v7  ;;  %v1068_v10 = vpop.f32.mrb[10].mxu1 }
 0x20d   :  { %v1069_v36 = vpop.f32.mrb[11].mxu1 }
 0x20e   :  { %v1070_v12 = vadd.f32 %v1069_v36, %v1068_v10  ;;  %v1200_v13 = vpack.c.bf16 %v823_v9, %v822_v8  ;;  %v816_v16 = vmul.f32 0.2, %v794_v35 }
 0x210   :  { %v799_v17 = vadd.f32 %v1070_v12, %v695_v37  ;;  %v1071_v21 = vpop.f32.mrb[12].mxu1  ;;  %1201 = vmatprep.subr.bf16.mxu1 %v1200_v13  ;;  %v824_v26 = vmax.f32 %v794_v35, %v816_v16 }
 0x211   :  { %v1072_v58 = vpop.f32.mrb[13].mxu1  ;;  %1203 = vmatpush3.bf16.msra.mxu1 %v1200_v13 }
 0x212   :  { %v817_v22 = vmul.f32 0.2, %v799_v17  ;;  %v1073_v61 = vadd.f32 %v1072_v58, %v1071_v21 }
 0x214   :  { %v825_v47 = vmax.f32 %v799_v17, %v817_v22  ;;  %v804_v39 = vadd.f32 %v1073_v61, %v700_v25  ;;  %v1074_v43 = vpop.f32.mrb[14].mxu1 }
 0x215   :  { %v1075_v56 = vpop.f32.mrb[15].mxu1 }
 0x216   :  { %v1076_v4 = vadd.f32 %v1075_v56, %v1074_v43  ;;  %v1204_v14 = vpack.c.bf16 %v825_v47, %v824_v26  ;;  %v818_v38 = vmul.f32 0.2, %v804_v39 }
 0x218   :  { %v809_v18 = vadd.f32 %v1076_v4, %v705_v29  ;;  %1205 = vmatprep.subr.bf16.mxu1 %v1204_v14  ;;  %v826_v40 = vmax.f32 %v804_v39, %v818_v38 }
 0x219   :  { %1207 = vmatpush3.bf16.msra.mxu1 %v1204_v14 }
 0x21a   :  { %v819_v30 = vmul.f32 0.2, %v809_v18 }
 0x21c   :  { %v827_v15 = vmax.f32 %v809_v18, %v819_v30 }
 0x21e   :  { %v1208_v41 = vpack.c.bf16 %v827_v15, %v826_v40 }
 0x220   :  { %1209 = vmatprep.subr.bf16.mxu1 %v1208_v41 }
 0x221   :  { %1211 = vmatpush3.bf16.msra.mxu1 %v1208_v41 }
 0x224   :  { %1156 = vmatmul.mubr.msk.f32.vlgmr.msra.gmra.mrb[16].mxu1 %vm842_vm4, %v829_v44 }
 0x2f7   :  { %v1157_v19 = vpop.f32.mrb[16].mxu1 }
 0x2f8   :  { %v921_v34 = vadd.f32 %v1157_v19, %v840_v46  ;;  %v915_v20 = vpop.f32.mrb[17].mxu1 }
 0x2f9   :  { %v916_v48 = vadd.f32 %v915_v20, %v835_v33 }
 0x2fa   :  { %v925_v49 = vsub.f32 0.0, %v921_v34 }
 0x2fb   :  { %v924_v50 = vsub.f32 0.0, %v916_v48 }
 0x2fc   :  { %v928_v51 = vmul.f32 1.442695, %v925_v49 }
 0x2fd   :  { %v926_v23 = vmul.f32 1.442695, %v924_v50 }
 0x2fe   :  { %1219 = vpow2.f32 %v928_v51 }
 0x2ff   :  { %1221 = vpow2.f32 %v926_v23 }
 0x308   :  { %v1220_v52 = vpop.eup %1219 }
 0x309   :  { %v1222_v24 = vpop.eup %1221  ;;  %v931_v53 = vadd.f32 1.0, %v1220_v52 }
 0x30a   :  { %v930_v42 = vadd.f32 1.0, %v1222_v24 }
 0x30b   :  { %1223 = vrcp.f32 %v931_v53 }
 0x30c   :  { %1225 = vrcp.f32 %v930_v42 }
 0x315   :  { %v1224_v54 = vpop.eup %1223 }
 0x316   :  { %v1226_v55 = vpop.eup %1225  ;;  %935 = vst [vmem:[#allocation2 + $0x8] sm:$0x1f] %v1224_v54 }
 0x317   :  { %934 = vst [vmem:[#allocation2] sm:$0xff] %v1226_v55 }
 0x318   :  { %1238 = shalt.err (!%p1235_p4)
}
 0x319   :  { %s1239_s15 = scalar_lea.hbm %s1703_s7, 256 }
 0x31a   :  { %p1240_p5 = scmp.ne.s32.totalorder %s1703_s7, %s1239_s15  ;;  %p1243_p6 = scmp.lt.u32.totalorder %s1239_s15, %s1703_s7 }
 0x31c   :  { %p1245_p7 = pnand %p1243_p6, %p1240_p5 }
 0x31e   :  { %1248 = shalt.err (!%p1245_p7)
}
 0x31f   :  { %s1254_s18 = smov 128   ;;  %s1255_s19 = smov 8  }
 0x320   :  { %947 = dma.vmem_to_hbm [thread:$0]  %s942_s11, 256, %s1703_s7, [#allocation3], %s1254_s18, %s1254_s18, %s1255_s19  }
 0x321   :  { %1249 = dma.done.wait [#allocation3], 256  }
 0x322   :  { %1250 = vsyncadd [#allocation3], 4294967040 }
 0x323   :  { %951 = vsyncpa [#allocation3], 1 }

</bundles_post_ra>
